<compile_context>
chip_gen: v7x
topology: tpu7x:2x2x1
jax: 0.10.0
libtpu: 0.0.40
codegen_flags: <defaults>
</compile_context>

<pallas_src>
import numpy as np
import jax
import jax.numpy as jnp
from jax import lax
from jax.experimental import pallas as pl
from jax.experimental.pallas import tpu as pltpu

OUT_H = 16           # out_h (PyTorch default 240; small for the example)
OUT_W = 16           # out_w
GRID_SIZE = 3
N_CTRL = GRID_SIZE * GRID_SIZE   # 9 control points

TILE_ROWS = 8        # sublanes per pixel tile


# ----------------------------------------------------------------------------
# Parameter setup (mirrors TpsGridGen.__init__ exactly, deterministic)
# ----------------------------------------------------------------------------
def control_points(grid_size):
    axis_coords = np.linspace(-1, 1, grid_size)
    P_Y, P_X = np.meshgrid(axis_coords, axis_coords)
    P_X = np.reshape(P_X, (-1,)).astype(np.float32)
    P_Y = np.reshape(P_Y, (-1,)).astype(np.float32)
    return P_X, P_Y


def compute_L_inverse(P_X, P_Y):
    # TODO(synk): torch.inverse has no Pallas equivalent; this 12x12 inverse is
    # one-time __init__ setup, done here in NumPy.
    n = P_X.shape[0]
    Xm = np.tile(P_X[:, None], (1, n))
    Ym = np.tile(P_Y[:, None], (1, n))
    d2 = (Xm - Xm.T) ** 2 + (Ym - Ym.T) ** 2
    d2[d2 == 0] = 1.0
    K = d2 * np.log(d2)
    OO = np.ones((n, 1), np.float32)
    Z = np.zeros((3, 3), np.float32)
    P = np.concatenate([OO, P_X[:, None], P_Y[:, None]], axis=1)
    L = np.concatenate(
        [np.concatenate([K, P], axis=1),
         np.concatenate([P.T, Z], axis=1)], axis=0)
    return np.linalg.inv(L).astype(np.float32)


# ----------------------------------------------------------------------------
# Tiling of the flattened pixel index
# ----------------------------------------------------------------------------
def _choose_layout(num_pixels):
    """Pick lane width (multiple of 128) and tile count for the flat pixel axis."""
    cols = 128
    for c in (1024, 512, 256, 128):
        cols = c
        if num_pixels >= 2 * TILE_ROWS * c:   # keep >= 2 grid steps when possible (v7x)
            break
    tile_pix = TILE_ROWS * cols
    n_tiles = -(-num_pixels // tile_pix)      # cdiv; tail tile is padded compute
    return cols, n_tiles, n_tiles * tile_pix


# ----------------------------------------------------------------------------
# Pallas kernel
# ----------------------------------------------------------------------------
def make_tps_kernel(P_X, P_Y, n, batch, out_h, out_w, cols):
    # Fold the per-control-point constants:  d = r2 + a_i*gx + b_i*gy + c_i
    a_c = [float(-2.0 * P_X[i]) for i in range(n)]
    b_c = [float(-2.0 * P_Y[i]) for i in range(n)]
    c_c = [float(P_X[i] * P_X[i] + P_Y[i] * P_Y[i]) for i in range(n)]
    step_x = float(2.0 / (out_w - 1))
    step_y = float(2.0 / (out_h - 1))
    inv_w = float(1.0 / out_w)
    w_f = float(out_w)
    tile_pix = TILE_ROWS * cols

    def tps_kernel(coeff_ref, o_ref, u_ref):
        # coeff_ref: SMEM [B, 2n+6], per batch: [Wx(n), Ax(3), Wy(n), Ay(3)]
        # o_ref:     VMEM (B, 2, TILE_ROWS, cols) output tile (lane-dense)
        # u_ref:     VMEM (n, TILE_ROWS, cols) scratch: batch-independent RBF terms
        t = pl.program_id(0)

        # ---- regular grid coordinates for this pixel tile, generated in-kernel
        r_i = lax.broadcasted_iota(jnp.int32, (TILE_ROWS, cols), 0)
        c_i = lax.broadcasted_iota(jnp.int32, (TILE_ROWS, cols), 1)
        p = t * tile_pix + r_i * cols + c_i          # flattened pixel index (exact)
        p_f = p.astype(jnp.float32)
        # exact floor(p / out_w): the +0.5 margin (>= 0.5/out_w) dwarfs f32 rounding
        row_f = jnp.floor((p_f + 0.5) * inv_w)
        col_f = p_f - row_f * w_f                    # exact (small integers)
        gx = col_f * step_x - 1.0                    # linspace(-1, 1, out_w)[col]
        gy = row_f * step_y - 1.0                    # linspace(-1, 1, out_h)[row]

        # ---- batch-independent radial-basis terms u_i = d^2 * log(d^2) -------
        r2 = gx * gx + gy * gy
        for i in range(n):
            d = r2 + a_c[i] * gx + b_c[i] * gy + c_c[i]
            # The folded form can round a true 0 to a tiny +/-eps; torch maps
            # d == 0 -> 1 (u = 0), so treat d <= 0 identically (keeps log finite).
            d = jnp.where(d <= 0.0, jnp.float32(1.0), d)
            u_ref[i] = d * jnp.log(d)

        # ---- per-batch affine part + weighted RBF sum (2*(n+3) FMAs / pixel) --
        # B is small here; for 2*B approaching the MXU width this reduction
        # would be better expressed as a [pix, n+3] x [n+3, 2B] matmul.
        for b in range(batch):
            ox = coeff_ref[b, n + 0] + coeff_ref[b, n + 1] * gx + coeff_ref[b, n + 2] * gy
            oy = (coeff_ref[b, 2 * n + 3] + coeff_ref[b, 2 * n + 4] * gx
                  + coeff_ref[b, 2 * n + 5] * gy)
            for i in range(n):
                u = u_ref[i]
                ox = ox + coeff_ref[b, i] * u
                oy = oy + coeff_ref[b, n + 3 + i] * u
            o_ref[b, 0] = ox
            o_ref[b, 1] = oy

    return tps_kernel


def tps_grid_gen(theta, Li, P_X, P_Y, out_h, out_w):
    """Pallas implementation of TpsGridGen.forward(theta) -> [B, H, W, 2]."""
    B = theta.shape[0]
    n = P_X.shape[0]
    hw = out_h * out_w
    cols, n_tiles, hw_pad = _choose_layout(hw)

    # tiny coefficient matmuls (glue): W = Li[:N,:N] @ Q, A = Li[N:,:N] @ Q
    Qx = theta[:, :n]
    Qy = theta[:, n:]
    hi = jax.lax.Precision.HIGHEST
    Wx = jnp.dot(Qx, Li[:n, :n].T, precision=hi)       # [B, n]
    Wy = jnp.dot(Qy, Li[:n, :n].T, precision=hi)
    Ax = jnp.dot(Qx, Li[n:, :n].T, precision=hi)       # [B, 3]
    Ay = jnp.dot(Qy, Li[n:, :n].T, precision=hi)
    coeffs = jnp.concatenate([Wx, Ax, Wy, Ay], axis=1).astype(jnp.float32)  # [B, 2n+6]

    kernel = make_tps_kernel(P_X, P_Y, n, B, out_h, out_w, cols)
    out = pl.pallas_call(
        kernel,
        out_shape=jax.ShapeDtypeStruct((B, 2, n_tiles * TILE_ROWS, cols), jnp.float32),
        grid_spec=pltpu.PrefetchScalarGridSpec(
            num_scalar_prefetch=0,
            grid=(n_tiles,),
            in_specs=[
                pl.BlockSpec(memory_space=pltpu.MemorySpace.SMEM),   # coeffs, whole array
            ],
            out_specs=pl.BlockSpec((B, 2, TILE_ROWS, cols), lambda t: (0, 0, t, 0)),
            scratch_shapes=[pltpu.VMEM((n, TILE_ROWS, cols), jnp.float32)],
        ),
        compiler_params=pltpu.CompilerParams(
            dimension_semantics=("parallel",)),
    )(coeffs)

    # Drop pixel padding and restore [B, 2, H, W] (free, row-major reshape).
    out = out.reshape(B, 2, hw_pad)[:, :, :hw].reshape(B, 2, out_h, out_w)
    # Downstream consumers could take the channel-first layout directly and skip
    # this extra HBM round-trip; it is kept only to match the PyTorch [B,H,W,2].
    return jnp.transpose(out, (0, 2, 3, 1))


# ----------------------------------------------------------------------------
# Pure-JAX reference (mirrors apply_transformation) for correctness check
# ----------------------------------------------------------------------------
def tps_reference(theta, gx, gy, Li, px, py):
    n = px.shape[0]
    hi = jax.lax.Precision.HIGHEST
    Qx = theta[:, :n]
    Qy = theta[:, n:]
    Wx = jnp.dot(Qx, Li[:n, :n].T, precision=hi)
    Wy = jnp.dot(Qy, Li[:n, :n].T, precision=hi)
    Ax = jnp.dot(Qx, Li[n:, :n].T, precision=hi)
    Ay = jnp.dot(Qy, Li[n:, :n].T, precision=hi)
    dx = gx[None, :, :, None] - px[None, None, None, :]
    dy = gy[None, :, :, None] - py[None, None, None, :]
    d = dx * dx + dy * dy
    d = jnp.where(d == 0.0, 1.0, d)
    U = d * jnp.log(d)
    tx = jnp.einsum('bn,zhwn->bhw', Wx, U, precision=hi)
    ty = jnp.einsum('bn,zhwn->bhw', Wy, U, precision=hi)
    ox = (Ax[:, 0, None, None] + Ax[:, 1, None, None] * gx[None]
          + Ax[:, 2, None, None] * gy[None] + tx)
    oy = (Ay[:, 0, None, None] + Ay[:, 1, None, None] * gx[None]
          + Ay[:, 2, None, None] * gy[None] + ty)
    return jnp.stack([ox, oy], axis=-1)   # [B, H, W, 2]


if __name__ == "__main__":
    # module setup (deterministic)
    P_X_np, P_Y_np = control_points(GRID_SIZE)
    Li_np = compute_L_inverse(P_X_np, P_Y_np)
    gx_np, gy_np = np.meshgrid(np.linspace(-1, 1, OUT_W).astype(np.float32),
                               np.linspace(-1, 1, OUT_H).astype(np.float32))

    grid_x = jnp.asarray(gx_np, jnp.float32)
    grid_y = jnp.asarray(gy_np, jnp.float32)
    Li = jnp.asarray(Li_np, jnp.float32)
    px = jnp.asarray(P_X_np, jnp.float32)
    py = jnp.asarray(P_Y_np, jnp.float32)

    # deterministic theta: identity control points + small perturbation
    B = 2
    key = jax.random.PRNGKey(0)
    base = jnp.concatenate([px, py])                       # [2N] identity TPS
    theta = base[None, :] + 0.1 * jax.random.normal(key, (B, 2 * N_CTRL), jnp.float32)

    out = tps_grid_gen(theta, Li, P_X_np, P_Y_np, OUT_H, OUT_W)
    out = jax.block_until_ready(out)

    ref = tps_reference(theta, grid_x, grid_y, Li, px, py)
    assert out.shape == (B, OUT_H, OUT_W, 2), out.shape
    np.testing.assert_allclose(np.asarray(out), np.asarray(ref), rtol=1e-4, atol=1e-4)
    print("KERNEL_OK")
</pallas_src>

<mosaic_0001>
module attributes {stable_mosaic.version = 11 : i64} {
  func.func @tps_kernel(%arg0: i32, %arg1: memref<2x24xf32, #tpu.memory_space<smem>>, %arg2: memref<2x2x8x128xf32, #tpu.memory_space<vmem>>, %arg3: memref<9x8x128xf32, #tpu.memory_space<vmem>>) attributes {dimension_semantics = [#tpu.dimension_semantics<parallel>], iteration_bounds = array<i64: 1>, scalar_prefetch = 0 : i64, scratch_operands = 1 : i64, tpu.core_type = #tpu.core_type<tc>, window_params = [{transform_indices = @transform_0, window_bounds = array<i64: 2, 24>}, {transform_indices = @transform_1, window_bounds = array<i64: 2, 2, 8, 128>}]} {
    %0 = tpu.iota {dimensions = array<i32: 0>} : vector<8x128xi32>
    %1 = tpu.iota {dimensions = array<i32: 1>} : vector<8x128xi32>
    %c1024_i32 = arith.constant 1024 : i32
    %2 = arith.muli %arg0, %c1024_i32 : i32
    %c128_i32 = arith.constant 128 : i32
    %3 = vector.broadcast %c128_i32 : i32 to vector<8x128xi32>
    %4 = arith.muli %0, %3 : vector<8x128xi32>
    %5 = vector.broadcast %2 : i32 to vector<8x128xi32>
    %6 = arith.addi %5, %4 : vector<8x128xi32>
    %7 = arith.addi %6, %1 : vector<8x128xi32>
    %8 = arith.sitofp %7 : vector<8x128xi32> to vector<8x128xf32>
    %cst = arith.constant 5.000000e-01 : f32
    %9 = vector.broadcast %cst : f32 to vector<8x128xf32>
    %10 = arith.addf %8, %9 : vector<8x128xf32>
    %cst_0 = arith.constant 6.250000e-02 : f32
    %11 = vector.broadcast %cst_0 : f32 to vector<8x128xf32>
    %12 = arith.mulf %10, %11 : vector<8x128xf32>
    %13 = math.floor %12 : vector<8x128xf32>
    %cst_1 = arith.constant 1.600000e+01 : f32
    %14 = vector.broadcast %cst_1 : f32 to vector<8x128xf32>
    %15 = arith.mulf %13, %14 : vector<8x128xf32>
    %16 = arith.subf %8, %15 : vector<8x128xf32>
    %cst_2 = arith.constant 0.13333334 : f32
    %17 = vector.broadcast %cst_2 : f32 to vector<8x128xf32>
    %18 = arith.mulf %16, %17 : vector<8x128xf32>
    %cst_3 = arith.constant 1.000000e+00 : f32
    %19 = vector.broadcast %cst_3 : f32 to vector<8x128xf32>
    %20 = arith.subf %18, %19 : vector<8x128xf32>
    %cst_4 = arith.constant 0.13333334 : f32
    %21 = vector.broadcast %cst_4 : f32 to vector<8x128xf32>
    %22 = arith.mulf %13, %21 : vector<8x128xf32>
    %cst_5 = arith.constant 1.000000e+00 : f32
    %23 = vector.broadcast %cst_5 : f32 to vector<8x128xf32>
    %24 = arith.subf %22, %23 : vector<8x128xf32>
    %25 = arith.mulf %20, %20 : vector<8x128xf32>
    %26 = arith.mulf %24, %24 : vector<8x128xf32>
    %27 = arith.addf %25, %26 : vector<8x128xf32>
    %cst_6 = arith.constant 2.000000e+00 : f32
    %28 = vector.broadcast %cst_6 : f32 to vector<8x128xf32>
    %29 = arith.mulf %28, %20 : vector<8x128xf32>
    %30 = arith.addf %27, %29 : vector<8x128xf32>
    %cst_7 = arith.constant 2.000000e+00 : f32
    %31 = vector.broadcast %cst_7 : f32 to vector<8x128xf32>
    %32 = arith.mulf %31, %24 : vector<8x128xf32>
    %33 = arith.addf %30, %32 : vector<8x128xf32>
    %cst_8 = arith.constant 2.000000e+00 : f32
    %34 = vector.broadcast %cst_8 : f32 to vector<8x128xf32>
    %35 = arith.addf %33, %34 : vector<8x128xf32>
    %cst_9 = arith.constant 0.000000e+00 : f32
    %36 = vector.broadcast %cst_9 : f32 to vector<8x128xf32>
    %37 = arith.cmpf ole, %35, %36 : vector<8x128xf32>
    %cst_10 = arith.constant 1.000000e+00 : f32
    %38 = vector.broadcast %cst_10 : f32 to vector<8x128xf32>
    %39 = arith.select %37, %38, %35 : vector<8x128xi1>, vector<8x128xf32>
    %40 = math.log %39 : vector<8x128xf32>
    %41 = arith.mulf %39, %40 : vector<8x128xf32>
    %c0 = arith.constant 0 : index
    %c0_11 = arith.constant 0 : index
    %c0_12 = arith.constant 0 : index
    %42 = vector.load %arg3[%c0, %c0_11, %c0_12] : memref<9x8x128xf32, #tpu.memory_space<vmem>>, vector<1x8x128xf32>
    %43 = vector.shape_cast %42 : vector<1x8x128xf32> to vector<8x128xf32>
    %44 = vector.shape_cast %41 : vector<8x128xf32> to vector<1x8x128xf32>
    tpu.vector_store %arg3[%c0, %c0_11, %c0_12], %44 {strides = array<i32>} : memref<9x8x128xf32, #tpu.memory_space<vmem>>, vector<1x8x128xf32>,
    %cst_13 = arith.constant 2.000000e+00 : f32
    %45 = vector.broadcast %cst_13 : f32 to vector<8x128xf32>
    %46 = arith.mulf %45, %20 : vector<8x128xf32>
    %47 = arith.addf %27, %46 : vector<8x128xf32>
    %cst_14 = arith.constant -0.000000e+00 : f32
    %48 = vector.broadcast %cst_14 : f32 to vector<8x128xf32>
    %49 = arith.mulf %48, %24 : vector<8x128xf32>
    %50 = arith.addf %47, %49 : vector<8x128xf32>
    %cst_15 = arith.constant 1.000000e+00 : f32
    %51 = vector.broadcast %cst_15 : f32 to vector<8x128xf32>
    %52 = arith.addf %50, %51 : vector<8x128xf32>
    %cst_16 = arith.constant 0.000000e+00 : f32
    %53 = vector.broadcast %cst_16 : f32 to vector<8x128xf32>
    %54 = arith.cmpf ole, %52, %53 : vector<8x128xf32>
    %cst_17 = arith.constant 1.000000e+00 : f32
    %55 = vector.broadcast %cst_17 : f32 to vector<8x128xf32>
    %56 = arith.select %54, %55, %52 : vector<8x128xi1>, vector<8x128xf32>
    %57 = math.log %56 : vector<8x128xf32>
    %58 = arith.mulf %56, %57 : vector<8x128xf32>
    %c1 = arith.constant 1 : index
    %c0_18 = arith.constant 0 : index
    %c0_19 = arith.constant 0 : index
    %59 = vector.load %arg3[%c1, %c0_18, %c0_19] : memref<9x8x128xf32, #tpu.memory_space<vmem>>, vector<1x8x128xf32>
    %60 = vector.shape_cast %59 : vector<1x8x128xf32> to vector<8x128xf32>
    %61 = vector.shape_cast %58 : vector<8x128xf32> to vector<1x8x128xf32>
    tpu.vector_store %arg3[%c1, %c0_18, %c0_19], %61 {strides = array<i32>} : memref<9x8x128xf32, #tpu.memory_space<vmem>>, vector<1x8x128xf32>,
    %cst_20 = arith.constant 2.000000e+00 : f32
    %62 = vector.broadcast %cst_20 : f32 to vector<8x128xf32>
    %63 = arith.mulf %62, %20 : vector<8x128xf32>
    %64 = arith.addf %27, %63 : vector<8x128xf32>
    %cst_21 = arith.constant -2.000000e+00 : f32
    %65 = vector.broadcast %cst_21 : f32 to vector<8x128xf32>
    %66 = arith.mulf %65, %24 : vector<8x128xf32>
    %67 = arith.addf %64, %66 : vector<8x128xf32>
    %cst_22 = arith.constant 2.000000e+00 : f32
    %68 = vector.broadcast %cst_22 : f32 to vector<8x128xf32>
    %69 = arith.addf %67, %68 : vector<8x128xf32>
    %cst_23 = arith.constant 0.000000e+00 : f32
    %70 = vector.broadcast %cst_23 : f32 to vector<8x128xf32>
    %71 = arith.cmpf ole, %69, %70 : vector<8x128xf32>
    %cst_24 = arith.constant 1.000000e+00 : f32
    %72 = vector.broadcast %cst_24 : f32 to vector<8x128xf32>
    %73 = arith.select %71, %72, %69 : vector<8x128xi1>, vector<8x128xf32>
    %74 = math.log %73 : vector<8x128xf32>
    %75 = arith.mulf %73, %74 : vector<8x128xf32>
    %c2 = arith.constant 2 : index
    %c0_25 = arith.constant 0 : index
    %c0_26 = arith.constant 0 : index
    %76 = vector.load %arg3[%c2, %c0_25, %c0_26] : memref<9x8x128xf32, #tpu.memory_space<vmem>>, vector<1x8x128xf32>
    %77 = vector.shape_cast %76 : vector<1x8x128xf32> to vector<8x128xf32>
    %78 = vector.shape_cast %75 : vector<8x128xf32> to vector<1x8x128xf32>
    tpu.vector_store %arg3[%c2, %c0_25, %c0_26], %78 {strides = array<i32>} : memref<9x8x128xf32, #tpu.memory_space<vmem>>, vector<1x8x128xf32>,
    %cst_27 = arith.constant -0.000000e+00 : f32
    %79 = vector.broadcast %cst_27 : f32 to vector<8x128xf32>
    %80 = arith.mulf %79, %20 : vector<8x128xf32>
    %81 = arith.addf %27, %80 : vector<8x128xf32>
    %cst_28 = arith.constant 2.000000e+00 : f32
    %82 = vector.broadcast %cst_28 : f32 to vector<8x128xf32>
    %83 = arith.mulf %82, %24 : vector<8x128xf32>
    %84 = arith.addf %81, %83 : vector<8x128xf32>
    %cst_29 = arith.constant 1.000000e+00 : f32
    %85 = vector.broadcast %cst_29 : f32 to vector<8x128xf32>
    %86 = arith.addf %84, %85 : vector<8x128xf32>
    %cst_30 = arith.constant 0.000000e+00 : f32
    %87 = vector.broadcast %cst_30 : f32 to vector<8x128xf32>
    %88 = arith.cmpf ole, %86, %87 : vector<8x128xf32>
    %cst_31 = arith.constant 1.000000e+00 : f32
    %89 = vector.broadcast %cst_31 : f32 to vector<8x128xf32>
    %90 = arith.select %88, %89, %86 : vector<8x128xi1>, vector<8x128xf32>
    %91 = math.log %90 : vector<8x128xf32>
    %92 = arith.mulf %90, %91 : vector<8x128xf32>
    %c3 = arith.constant 3 : index
    %c0_32 = arith.constant 0 : index
    %c0_33 = arith.constant 0 : index
    %93 = vector.load %arg3[%c3, %c0_32, %c0_33] : memref<9x8x128xf32, #tpu.memory_space<vmem>>, vector<1x8x128xf32>
    %94 = vector.shape_cast %93 : vector<1x8x128xf32> to vector<8x128xf32>
    %95 = vector.shape_cast %92 : vector<8x128xf32> to vector<1x8x128xf32>
    tpu.vector_store %arg3[%c3, %c0_32, %c0_33], %95 {strides = array<i32>} : memref<9x8x128xf32, #tpu.memory_space<vmem>>, vector<1x8x128xf32>,
    %cst_34 = arith.constant -0.000000e+00 : f32
    %96 = vector.broadcast %cst_34 : f32 to vector<8x128xf32>
    %97 = arith.mulf %96, %20 : vector<8x128xf32>
    %98 = arith.addf %27, %97 : vector<8x128xf32>
    %cst_35 = arith.constant -0.000000e+00 : f32
    %99 = vector.broadcast %cst_35 : f32 to vector<8x128xf32>
    %100 = arith.mulf %99, %24 : vector<8x128xf32>
    %101 = arith.addf %98, %100 : vector<8x128xf32>
    %cst_36 = arith.constant 0.000000e+00 : f32
    %102 = vector.broadcast %cst_36 : f32 to vector<8x128xf32>
    %103 = arith.addf %101, %102 : vector<8x128xf32>
    %cst_37 = arith.constant 0.000000e+00 : f32
    %104 = vector.broadcast %cst_37 : f32 to vector<8x128xf32>
    %105 = arith.cmpf ole, %103, %104 : vector<8x128xf32>
    %cst_38 = arith.constant 1.000000e+00 : f32
    %106 = vector.broadcast %cst_38 : f32 to vector<8x128xf32>
    %107 = arith.select %105, %106, %103 : vector<8x128xi1>, vector<8x128xf32>
    %108 = math.log %107 : vector<8x128xf32>
    %109 = arith.mulf %107, %108 : vector<8x128xf32>
    %c4 = arith.constant 4 : index
    %c0_39 = arith.constant 0 : index
    %c0_40 = arith.constant 0 : index
    %110 = vector.load %arg3[%c4, %c0_39, %c0_40] : memref<9x8x128xf32, #tpu.memory_space<vmem>>, vector<1x8x128xf32>
    %111 = vector.shape_cast %110 : vector<1x8x128xf32> to vector<8x128xf32>
    %112 = vector.shape_cast %109 : vector<8x128xf32> to vector<1x8x128xf32>
    tpu.vector_store %arg3[%c4, %c0_39, %c0_40], %112 {strides = array<i32>} : memref<9x8x128xf32, #tpu.memory_space<vmem>>, vector<1x8x128xf32>,
    %cst_41 = arith.constant -0.000000e+00 : f32
    %113 = vector.broadcast %cst_41 : f32 to vector<8x128xf32>
    %114 = arith.mulf %113, %20 : vector<8x128xf32>
    %115 = arith.addf %27, %114 : vector<8x128xf32>
    %cst_42 = arith.constant -2.000000e+00 : f32
    %116 = vector.broadcast %cst_42 : f32 to vector<8x128xf32>
    %117 = arith.mulf %116, %24 : vector<8x128xf32>
    %118 = arith.addf %115, %117 : vector<8x128xf32>
    %cst_43 = arith.constant 1.000000e+00 : f32
    %119 = vector.broadcast %cst_43 : f32 to vector<8x128xf32>
    %120 = arith.addf %118, %119 : vector<8x128xf32>
    %cst_44 = arith.constant 0.000000e+00 : f32
    %121 = vector.broadcast %cst_44 : f32 to vector<8x128xf32>
    %122 = arith.cmpf ole, %120, %121 : vector<8x128xf32>
    %cst_45 = arith.constant 1.000000e+00 : f32
    %123 = vector.broadcast %cst_45 : f32 to vector<8x128xf32>
    %124 = arith.select %122, %123, %120 : vector<8x128xi1>, vector<8x128xf32>
    %125 = math.log %124 : vector<8x128xf32>
    %126 = arith.mulf %124, %125 : vector<8x128xf32>
    %c5 = arith.constant 5 : index
    %c0_46 = arith.constant 0 : index
    %c0_47 = arith.constant 0 : index
    %127 = vector.load %arg3[%c5, %c0_46, %c0_47] : memref<9x8x128xf32, #tpu.memory_space<vmem>>, vector<1x8x128xf32>
    %128 = vector.shape_cast %127 : vector<1x8x128xf32> to vector<8x128xf32>
    %129 = vector.shape_cast %126 : vector<8x128xf32> to vector<1x8x128xf32>
    tpu.vector_store %arg3[%c5, %c0_46, %c0_47], %129 {strides = array<i32>} : memref<9x8x128xf32, #tpu.memory_space<vmem>>, vector<1x8x128xf32>,
    %cst_48 = arith.constant -2.000000e+00 : f32
    %130 = vector.broadcast %cst_48 : f32 to vector<8x128xf32>
    %131 = arith.mulf %130, %20 : vector<8x128xf32>
    %132 = arith.addf %27, %131 : vector<8x128xf32>
    %cst_49 = arith.constant 2.000000e+00 : f32
    %133 = vector.broadcast %cst_49 : f32 to vector<8x128xf32>
    %134 = arith.mulf %133, %24 : vector<8x128xf32>
    %135 = arith.addf %132, %134 : vector<8x128xf32>
    %cst_50 = arith.constant 2.000000e+00 : f32
    %136 = vector.broadcast %cst_50 : f32 to vector<8x128xf32>
    %137 = arith.addf %135, %136 : vector<8x128xf32>
    %cst_51 = arith.constant 0.000000e+00 : f32
    %138 = vector.broadcast %cst_51 : f32 to vector<8x128xf32>
    %139 = arith.cmpf ole, %137, %138 : vector<8x128xf32>
    %cst_52 = arith.constant 1.000000e+00 : f32
    %140 = vector.broadcast %cst_52 : f32 to vector<8x128xf32>
    %141 = arith.select %139, %140, %137 : vector<8x128xi1>, vector<8x128xf32>
    %142 = math.log %141 : vector<8x128xf32>
    %143 = arith.mulf %141, %142 : vector<8x128xf32>
    %c6 = arith.constant 6 : index
    %c0_53 = arith.constant 0 : index
    %c0_54 = arith.constant 0 : index
    %144 = vector.load %arg3[%c6, %c0_53, %c0_54] : memref<9x8x128xf32, #tpu.memory_space<vmem>>, vector<1x8x128xf32>
    %145 = vector.shape_cast %144 : vector<1x8x128xf32> to vector<8x128xf32>
    %146 = vector.shape_cast %143 : vector<8x128xf32> to vector<1x8x128xf32>
    tpu.vector_store %arg3[%c6, %c0_53, %c0_54], %146 {strides = array<i32>} : memref<9x8x128xf32, #tpu.memory_space<vmem>>, vector<1x8x128xf32>,
    %cst_55 = arith.constant -2.000000e+00 : f32
    %147 = vector.broadcast %cst_55 : f32 to vector<8x128xf32>
    %148 = arith.mulf %147, %20 : vector<8x128xf32>
    %149 = arith.addf %27, %148 : vector<8x128xf32>
    %cst_56 = arith.constant -0.000000e+00 : f32
    %150 = vector.broadcast %cst_56 : f32 to vector<8x128xf32>
    %151 = arith.mulf %150, %24 : vector<8x128xf32>
    %152 = arith.addf %149, %151 : vector<8x128xf32>
    %cst_57 = arith.constant 1.000000e+00 : f32
    %153 = vector.broadcast %cst_57 : f32 to vector<8x128xf32>
    %154 = arith.addf %152, %153 : vector<8x128xf32>
    %cst_58 = arith.constant 0.000000e+00 : f32
    %155 = vector.broadcast %cst_58 : f32 to vector<8x128xf32>
    %156 = arith.cmpf ole, %154, %155 : vector<8x128xf32>
    %cst_59 = arith.constant 1.000000e+00 : f32
    %157 = vector.broadcast %cst_59 : f32 to vector<8x128xf32>
    %158 = arith.select %156, %157, %154 : vector<8x128xi1>, vector<8x128xf32>
    %159 = math.log %158 : vector<8x128xf32>
    %160 = arith.mulf %158, %159 : vector<8x128xf32>
    %c7 = arith.constant 7 : index
    %c0_60 = arith.constant 0 : index
    %c0_61 = arith.constant 0 : index
    %161 = vector.load %arg3[%c7, %c0_60, %c0_61] : memref<9x8x128xf32, #tpu.memory_space<vmem>>, vector<1x8x128xf32>
    %162 = vector.shape_cast %161 : vector<1x8x128xf32> to vector<8x128xf32>
    %163 = vector.shape_cast %160 : vector<8x128xf32> to vector<1x8x128xf32>
    tpu.vector_store %arg3[%c7, %c0_60, %c0_61], %163 {strides = array<i32>} : memref<9x8x128xf32, #tpu.memory_space<vmem>>, vector<1x8x128xf32>,
    %cst_62 = arith.constant -2.000000e+00 : f32
    %164 = vector.broadcast %cst_62 : f32 to vector<8x128xf32>
    %165 = arith.mulf %164, %20 : vector<8x128xf32>
    %166 = arith.addf %27, %165 : vector<8x128xf32>
    %cst_63 = arith.constant -2.000000e+00 : f32
    %167 = vector.broadcast %cst_63 : f32 to vector<8x128xf32>
    %168 = arith.mulf %167, %24 : vector<8x128xf32>
    %169 = arith.addf %166, %168 : vector<8x128xf32>
    %cst_64 = arith.constant 2.000000e+00 : f32
    %170 = vector.broadcast %cst_64 : f32 to vector<8x128xf32>
    %171 = arith.addf %169, %170 : vector<8x128xf32>
    %cst_65 = arith.constant 0.000000e+00 : f32
    %172 = vector.broadcast %cst_65 : f32 to vector<8x128xf32>
    %173 = arith.cmpf ole, %171, %172 : vector<8x128xf32>
    %cst_66 = arith.constant 1.000000e+00 : f32
    %174 = vector.broadcast %cst_66 : f32 to vector<8x128xf32>
    %175 = arith.select %173, %174, %171 : vector<8x128xi1>, vector<8x128xf32>
    %176 = math.log %175 : vector<8x128xf32>
    %177 = arith.mulf %175, %176 : vector<8x128xf32>
    %c8 = arith.constant 8 : index
    %c0_67 = arith.constant 0 : index
    %c0_68 = arith.constant 0 : index
    %178 = vector.load %arg3[%c8, %c0_67, %c0_68] : memref<9x8x128xf32, #tpu.memory_space<vmem>>, vector<1x8x128xf32>
    %179 = vector.shape_cast %178 : vector<1x8x128xf32> to vector<8x128xf32>
    %180 = vector.shape_cast %177 : vector<8x128xf32> to vector<1x8x128xf32>
    tpu.vector_store %arg3[%c8, %c0_67, %c0_68], %180 {strides = array<i32>} : memref<9x8x128xf32, #tpu.memory_space<vmem>>, vector<1x8x128xf32>,
    %c0_69 = arith.constant 0 : index
    %c9 = arith.constant 9 : index
    %181 = memref.load %arg1[%c0_69, %c9] : memref<2x24xf32, #tpu.memory_space<smem>>
    %c0_70 = arith.constant 0 : index
    %c10 = arith.constant 10 : index
    %182 = memref.load %arg1[%c0_70, %c10] : memref<2x24xf32, #tpu.memory_space<smem>>
    %183 = vector.broadcast %182 : f32 to vector<8x128xf32>
    %184 = arith.mulf %183, %20 : vector<8x128xf32>
    %185 = vector.broadcast %181 : f32 to vector<8x128xf32>
    %186 = arith.addf %185, %184 : vector<8x128xf32>
    %c0_71 = arith.constant 0 : index
    %c11 = arith.constant 11 : index
    %187 = memref.load %arg1[%c0_71, %c11] : memref<2x24xf32, #tpu.memory_space<smem>>
    %188 = vector.broadcast %187 : f32 to vector<8x128xf32>
    %189 = arith.mulf %188, %24 : vector<8x128xf32>
    %190 = arith.addf %186, %189 : vector<8x128xf32>
    %c0_72 = arith.constant 0 : index
    %c21 = arith.constant 21 : index
    %191 = memref.load %arg1[%c0_72, %c21] : memref<2x24xf32, #tpu.memory_space<smem>>
    %c0_73 = arith.constant 0 : index
    %c22 = arith.constant 22 : index
    %192 = memref.load %arg1[%c0_73, %c22] : memref<2x24xf32, #tpu.memory_space<smem>>
    %193 = vector.broadcast %192 : f32 to vector<8x128xf32>
    %194 = arith.mulf %193, %20 : vector<8x128xf32>
    %195 = vector.broadcast %191 : f32 to vector<8x128xf32>
    %196 = arith.addf %195, %194 : vector<8x128xf32>
    %c0_74 = arith.constant 0 : index
    %c23 = arith.constant 23 : index
    %197 = memref.load %arg1[%c0_74, %c23] : memref<2x24xf32, #tpu.memory_space<smem>>
    %198 = vector.broadcast %197 : f32 to vector<8x128xf32>
    %199 = arith.mulf %198, %24 : vector<8x128xf32>
    %200 = arith.addf %196, %199 : vector<8x128xf32>
    %c0_75 = arith.constant 0 : index
    %c0_76 = arith.constant 0 : index
    %c0_77 = arith.constant 0 : index
    %201 = vector.load %arg3[%c0_75, %c0_76, %c0_77] : memref<9x8x128xf32, #tpu.memory_space<vmem>>, vector<1x8x128xf32>
    %202 = vector.shape_cast %201 : vector<1x8x128xf32> to vector<8x128xf32>
    %c0_78 = arith.constant 0 : index
    %c0_79 = arith.constant 0 : index
    %203 = memref.load %arg1[%c0_78, %c0_79] : memref<2x24xf32, #tpu.memory_space<smem>>
    %204 = vector.broadcast %203 : f32 to vector<8x128xf32>
    %205 = arith.mulf %204, %202 : vector<8x128xf32>
    %206 = arith.addf %190, %205 : vector<8x128xf32>
    %c0_80 = arith.constant 0 : index
    %c12 = arith.constant 12 : index
    %207 = memref.load %arg1[%c0_80, %c12] : memref<2x24xf32, #tpu.memory_space<smem>>
    %208 = vector.broadcast %207 : f32 to vector<8x128xf32>
    %209 = arith.mulf %208, %202 : vector<8x128xf32>
    %210 = arith.addf %200, %209 : vector<8x128xf32>
    %c1_81 = arith.constant 1 : index
    %c0_82 = arith.constant 0 : index
    %c0_83 = arith.constant 0 : index
    %211 = vector.load %arg3[%c1_81, %c0_82, %c0_83] : memref<9x8x128xf32, #tpu.memory_space<vmem>>, vector<1x8x128xf32>
    %212 = vector.shape_cast %211 : vector<1x8x128xf32> to vector<8x128xf32>
    %c0_84 = arith.constant 0 : index
    %c1_85 = arith.constant 1 : index
    %213 = memref.load %arg1[%c0_84, %c1_85] : memref<2x24xf32, #tpu.memory_space<smem>>
    %214 = vector.broadcast %213 : f32 to vector<8x128xf32>
    %215 = arith.mulf %214, %212 : vector<8x128xf32>
    %216 = arith.addf %206, %215 : vector<8x128xf32>
    %c0_86 = arith.constant 0 : index
    %c13 = arith.constant 13 : index
    %217 = memref.load %arg1[%c0_86, %c13] : memref<2x24xf32, #tpu.memory_space<smem>>
    %218 = vector.broadcast %217 : f32 to vector<8x128xf32>
    %219 = arith.mulf %218, %212 : vector<8x128xf32>
    %220 = arith.addf %210, %219 : vector<8x128xf32>
    %c2_87 = arith.constant 2 : index
    %c0_88 = arith.constant 0 : index
    %c0_89 = arith.constant 0 : index
    %221 = vector.load %arg3[%c2_87, %c0_88, %c0_89] : memref<9x8x128xf32, #tpu.memory_space<vmem>>, vector<1x8x128xf32>
    %222 = vector.shape_cast %221 : vector<1x8x128xf32> to vector<8x128xf32>
    %c0_90 = arith.constant 0 : index
    %c2_91 = arith.constant 2 : index
    %223 = memref.load %arg1[%c0_90, %c2_91] : memref<2x24xf32, #tpu.memory_space<smem>>
    %224 = vector.broadcast %223 : f32 to vector<8x128xf32>
    %225 = arith.mulf %224, %222 : vector<8x128xf32>
    %226 = arith.addf %216, %225 : vector<8x128xf32>
    %c0_92 = arith.constant 0 : index
    %c14 = arith.constant 14 : index
    %227 = memref.load %arg1[%c0_92, %c14] : memref<2x24xf32, #tpu.memory_space<smem>>
    %228 = vector.broadcast %227 : f32 to vector<8x128xf32>
    %229 = arith.mulf %228, %222 : vector<8x128xf32>
    %230 = arith.addf %220, %229 : vector<8x128xf32>
    %c3_93 = arith.constant 3 : index
    %c0_94 = arith.constant 0 : index
    %c0_95 = arith.constant 0 : index
    %231 = vector.load %arg3[%c3_93, %c0_94, %c0_95] : memref<9x8x128xf32, #tpu.memory_space<vmem>>, vector<1x8x128xf32>
    %232 = vector.shape_cast %231 : vector<1x8x128xf32> to vector<8x128xf32>
    %c0_96 = arith.constant 0 : index
    %c3_97 = arith.constant 3 : index
    %233 = memref.load %arg1[%c0_96, %c3_97] : memref<2x24xf32, #tpu.memory_space<smem>>
    %234 = vector.broadcast %233 : f32 to vector<8x128xf32>
    %235 = arith.mulf %234, %232 : vector<8x128xf32>
    %236 = arith.addf %226, %235 : vector<8x128xf32>
    %c0_98 = arith.constant 0 : index
    %c15 = arith.constant 15 : index
    %237 = memref.load %arg1[%c0_98, %c15] : memref<2x24xf32, #tpu.memory_space<smem>>
    %238 = vector.broadcast %237 : f32 to vector<8x128xf32>
    %239 = arith.mulf %238, %232 : vector<8x128xf32>
    %240 = arith.addf %230, %239 : vector<8x128xf32>
    %c4_99 = arith.constant 4 : index
    %c0_100 = arith.constant 0 : index
    %c0_101 = arith.constant 0 : index
    %241 = vector.load %arg3[%c4_99, %c0_100, %c0_101] : memref<9x8x128xf32, #tpu.memory_space<vmem>>, vector<1x8x128xf32>
    %242 = vector.shape_cast %241 : vector<1x8x128xf32> to vector<8x128xf32>
    %c0_102 = arith.constant 0 : index
    %c4_103 = arith.constant 4 : index
    %243 = memref.load %arg1[%c0_102, %c4_103] : memref<2x24xf32, #tpu.memory_space<smem>>
    %244 = vector.broadcast %243 : f32 to vector<8x128xf32>
    %245 = arith.mulf %244, %242 : vector<8x128xf32>
    %246 = arith.addf %236, %245 : vector<8x128xf32>
    %c0_104 = arith.constant 0 : index
    %c16 = arith.constant 16 : index
    %247 = memref.load %arg1[%c0_104, %c16] : memref<2x24xf32, #tpu.memory_space<smem>>
    %248 = vector.broadcast %247 : f32 to vector<8x128xf32>
    %249 = arith.mulf %248, %242 : vector<8x128xf32>
    %250 = arith.addf %240, %249 : vector<8x128xf32>
    %c5_105 = arith.constant 5 : index
    %c0_106 = arith.constant 0 : index
    %c0_107 = arith.constant 0 : index
    %251 = vector.load %arg3[%c5_105, %c0_106, %c0_107] : memref<9x8x128xf32, #tpu.memory_space<vmem>>, vector<1x8x128xf32>
    %252 = vector.shape_cast %251 : vector<1x8x128xf32> to vector<8x128xf32>
    %c0_108 = arith.constant 0 : index
    %c5_109 = arith.constant 5 : index
    %253 = memref.load %arg1[%c0_108, %c5_109] : memref<2x24xf32, #tpu.memory_space<smem>>
    %254 = vector.broadcast %253 : f32 to vector<8x128xf32>
    %255 = arith.mulf %254, %252 : vector<8x128xf32>
    %256 = arith.addf %246, %255 : vector<8x128xf32>
    %c0_110 = arith.constant 0 : index
    %c17 = arith.constant 17 : index
    %257 = memref.load %arg1[%c0_110, %c17] : memref<2x24xf32, #tpu.memory_space<smem>>
    %258 = vector.broadcast %257 : f32 to vector<8x128xf32>
    %259 = arith.mulf %258, %252 : vector<8x128xf32>
    %260 = arith.addf %250, %259 : vector<8x128xf32>
    %c6_111 = arith.constant 6 : index
    %c0_112 = arith.constant 0 : index
    %c0_113 = arith.constant 0 : index
    %261 = vector.load %arg3[%c6_111, %c0_112, %c0_113] : memref<9x8x128xf32, #tpu.memory_space<vmem>>, vector<1x8x128xf32>
    %262 = vector.shape_cast %261 : vector<1x8x128xf32> to vector<8x128xf32>
    %c0_114 = arith.constant 0 : index
    %c6_115 = arith.constant 6 : index
    %263 = memref.load %arg1[%c0_114, %c6_115] : memref<2x24xf32, #tpu.memory_space<smem>>
    %264 = vector.broadcast %263 : f32 to vector<8x128xf32>
    %265 = arith.mulf %264, %262 : vector<8x128xf32>
    %266 = arith.addf %256, %265 : vector<8x128xf32>
    %c0_116 = arith.constant 0 : index
    %c18 = arith.constant 18 : index
    %267 = memref.load %arg1[%c0_116, %c18] : memref<2x24xf32, #tpu.memory_space<smem>>
    %268 = vector.broadcast %267 : f32 to vector<8x128xf32>
    %269 = arith.mulf %268, %262 : vector<8x128xf32>
    %270 = arith.addf %260, %269 : vector<8x128xf32>
    %c7_117 = arith.constant 7 : index
    %c0_118 = arith.constant 0 : index
    %c0_119 = arith.constant 0 : index
    %271 = vector.load %arg3[%c7_117, %c0_118, %c0_119] : memref<9x8x128xf32, #tpu.memory_space<vmem>>, vector<1x8x128xf32>
    %272 = vector.shape_cast %271 : vector<1x8x128xf32> to vector<8x128xf32>
    %c0_120 = arith.constant 0 : index
    %c7_121 = arith.constant 7 : index
    %273 = memref.load %arg1[%c0_120, %c7_121] : memref<2x24xf32, #tpu.memory_space<smem>>
    %274 = vector.broadcast %273 : f32 to vector<8x128xf32>
    %275 = arith.mulf %274, %272 : vector<8x128xf32>
    %276 = arith.addf %266, %275 : vector<8x128xf32>
    %c0_122 = arith.constant 0 : index
    %c19 = arith.constant 19 : index
    %277 = memref.load %arg1[%c0_122, %c19] : memref<2x24xf32, #tpu.memory_space<smem>>
    %278 = vector.broadcast %277 : f32 to vector<8x128xf32>
    %279 = arith.mulf %278, %272 : vector<8x128xf32>
    %280 = arith.addf %270, %279 : vector<8x128xf32>
    %c8_123 = arith.constant 8 : index
    %c0_124 = arith.constant 0 : index
    %c0_125 = arith.constant 0 : index
    %281 = vector.load %arg3[%c8_123, %c0_124, %c0_125] : memref<9x8x128xf32, #tpu.memory_space<vmem>>, vector<1x8x128xf32>
    %282 = vector.shape_cast %281 : vector<1x8x128xf32> to vector<8x128xf32>
    %c0_126 = arith.constant 0 : index
    %c8_127 = arith.constant 8 : index
    %283 = memref.load %arg1[%c0_126, %c8_127] : memref<2x24xf32, #tpu.memory_space<smem>>
    %284 = vector.broadcast %283 : f32 to vector<8x128xf32>
    %285 = arith.mulf %284, %282 : vector<8x128xf32>
    %286 = arith.addf %276, %285 : vector<8x128xf32>
    %c0_128 = arith.constant 0 : index
    %c20 = arith.constant 20 : index
    %287 = memref.load %arg1[%c0_128, %c20] : memref<2x24xf32, #tpu.memory_space<smem>>
    %288 = vector.broadcast %287 : f32 to vector<8x128xf32>
    %289 = arith.mulf %288, %282 : vector<8x128xf32>
    %290 = arith.addf %280, %289 : vector<8x128xf32>
    %c0_129 = arith.constant 0 : index
    %c0_130 = arith.constant 0 : index
    %c0_131 = arith.constant 0 : index
    %c0_132 = arith.constant 0 : index
    %291 = vector.load %arg2[%c0_129, %c0_130, %c0_131, %c0_132] : memref<2x2x8x128xf32, #tpu.memory_space<vmem>>, vector<1x1x8x128xf32>
    %292 = vector.shape_cast %291 : vector<1x1x8x128xf32> to vector<8x128xf32>
    %293 = vector.shape_cast %286 : vector<8x128xf32> to vector<1x1x8x128xf32>
    tpu.vector_store %arg2[%c0_129, %c0_130, %c0_131, %c0_132], %293 {strides = array<i32>} : memref<2x2x8x128xf32, #tpu.memory_space<vmem>>, vector<1x1x8x128xf32>,
    %c0_133 = arith.constant 0 : index
    %c1_134 = arith.constant 1 : index
    %c0_135 = arith.constant 0 : index
    %c0_136 = arith.constant 0 : index
    %294 = vector.load %arg2[%c0_133, %c1_134, %c0_135, %c0_136] : memref<2x2x8x128xf32, #tpu.memory_space<vmem>>, vector<1x1x8x128xf32>
    %295 = vector.shape_cast %294 : vector<1x1x8x128xf32> to vector<8x128xf32>
    %296 = vector.shape_cast %290 : vector<8x128xf32> to vector<1x1x8x128xf32>
    tpu.vector_store %arg2[%c0_133, %c1_134, %c0_135, %c0_136], %296 {strides = array<i32>} : memref<2x2x8x128xf32, #tpu.memory_space<vmem>>, vector<1x1x8x128xf32>,
    %c1_137 = arith.constant 1 : index
    %c9_138 = arith.constant 9 : index
    %297 = memref.load %arg1[%c1_137, %c9_138] : memref<2x24xf32, #tpu.memory_space<smem>>
    %c1_139 = arith.constant 1 : index
    %c10_140 = arith.constant 10 : index
    %298 = memref.load %arg1[%c1_139, %c10_140] : memref<2x24xf32, #tpu.memory_space<smem>>
    %299 = vector.broadcast %298 : f32 to vector<8x128xf32>
    %300 = arith.mulf %299, %20 : vector<8x128xf32>
    %301 = vector.broadcast %297 : f32 to vector<8x128xf32>
    %302 = arith.addf %301, %300 : vector<8x128xf32>
    %c1_141 = arith.constant 1 : index
    %c11_142 = arith.constant 11 : index
    %303 = memref.load %arg1[%c1_141, %c11_142] : memref<2x24xf32, #tpu.memory_space<smem>>
    %304 = vector.broadcast %303 : f32 to vector<8x128xf32>
    %305 = arith.mulf %304, %24 : vector<8x128xf32>
    %306 = arith.addf %302, %305 : vector<8x128xf32>
    %c1_143 = arith.constant 1 : index
    %c21_144 = arith.constant 21 : index
    %307 = memref.load %arg1[%c1_143, %c21_144] : memref<2x24xf32, #tpu.memory_space<smem>>
    %c1_145 = arith.constant 1 : index
    %c22_146 = arith.constant 22 : index
    %308 = memref.load %arg1[%c1_145, %c22_146] : memref<2x24xf32, #tpu.memory_space<smem>>
    %309 = vector.broadcast %308 : f32 to vector<8x128xf32>
    %310 = arith.mulf %309, %20 : vector<8x128xf32>
    %311 = vector.broadcast %307 : f32 to vector<8x128xf32>
    %312 = arith.addf %311, %310 : vector<8x128xf32>
    %c1_147 = arith.constant 1 : index
    %c23_148 = arith.constant 23 : index
    %313 = memref.load %arg1[%c1_147, %c23_148] : memref<2x24xf32, #tpu.memory_space<smem>>
    %314 = vector.broadcast %313 : f32 to vector<8x128xf32>
    %315 = arith.mulf %314, %24 : vector<8x128xf32>
    %316 = arith.addf %312, %315 : vector<8x128xf32>
    %c0_149 = arith.constant 0 : index
    %c0_150 = arith.constant 0 : index
    %c0_151 = arith.constant 0 : index
    %317 = vector.load %arg3[%c0_149, %c0_150, %c0_151] : memref<9x8x128xf32, #tpu.memory_space<vmem>>, vector<1x8x128xf32>
    %318 = vector.shape_cast %317 : vector<1x8x128xf32> to vector<8x128xf32>
    %c1_152 = arith.constant 1 : index
    %c0_153 = arith.constant 0 : index
    %319 = memref.load %arg1[%c1_152, %c0_153] : memref<2x24xf32, #tpu.memory_space<smem>>
    %320 = vector.broadcast %319 : f32 to vector<8x128xf32>
    %321 = arith.mulf %320, %318 : vector<8x128xf32>
    %322 = arith.addf %306, %321 : vector<8x128xf32>
    %c1_154 = arith.constant 1 : index
    %c12_155 = arith.constant 12 : index
    %323 = memref.load %arg1[%c1_154, %c12_155] : memref<2x24xf32, #tpu.memory_space<smem>>
    %324 = vector.broadcast %323 : f32 to vector<8x128xf32>
    %325 = arith.mulf %324, %318 : vector<8x128xf32>
    %326 = arith.addf %316, %325 : vector<8x128xf32>
    %c1_156 = arith.constant 1 : index
    %c0_157 = arith.constant 0 : index
    %c0_158 = arith.constant 0 : index
    %327 = vector.load %arg3[%c1_156, %c0_157, %c0_158] : memref<9x8x128xf32, #tpu.memory_space<vmem>>, vector<1x8x128xf32>
    %328 = vector.shape_cast %327 : vector<1x8x128xf32> to vector<8x128xf32>
    %c1_159 = arith.constant 1 : index
    %c1_160 = arith.constant 1 : index
    %329 = memref.load %arg1[%c1_159, %c1_160] : memref<2x24xf32, #tpu.memory_space<smem>>
    %330 = vector.broadcast %329 : f32 to vector<8x128xf32>
    %331 = arith.mulf %330, %328 : vector<8x128xf32>
    %332 = arith.addf %322, %331 : vector<8x128xf32>
    %c1_161 = arith.constant 1 : index
    %c13_162 = arith.constant 13 : index
    %333 = memref.load %arg1[%c1_161, %c13_162] : memref<2x24xf32, #tpu.memory_space<smem>>
    %334 = vector.broadcast %333 : f32 to vector<8x128xf32>
    %335 = arith.mulf %334, %328 : vector<8x128xf32>
    %336 = arith.addf %326, %335 : vector<8x128xf32>
    %c2_163 = arith.constant 2 : index
    %c0_164 = arith.constant 0 : index
    %c0_165 = arith.constant 0 : index
    %337 = vector.load %arg3[%c2_163, %c0_164, %c0_165] : memref<9x8x128xf32, #tpu.memory_space<vmem>>, vector<1x8x128xf32>
    %338 = vector.shape_cast %337 : vector<1x8x128xf32> to vector<8x128xf32>
    %c1_166 = arith.constant 1 : index
    %c2_167 = arith.constant 2 : index
    %339 = memref.load %arg1[%c1_166, %c2_167] : memref<2x24xf32, #tpu.memory_space<smem>>
    %340 = vector.broadcast %339 : f32 to vector<8x128xf32>
    %341 = arith.mulf %340, %338 : vector<8x128xf32>
    %342 = arith.addf %332, %341 : vector<8x128xf32>
    %c1_168 = arith.constant 1 : index
    %c14_169 = arith.constant 14 : index
    %343 = memref.load %arg1[%c1_168, %c14_169] : memref<2x24xf32, #tpu.memory_space<smem>>
    %344 = vector.broadcast %343 : f32 to vector<8x128xf32>
    %345 = arith.mulf %344, %338 : vector<8x128xf32>
    %346 = arith.addf %336, %345 : vector<8x128xf32>
    %c3_170 = arith.constant 3 : index
    %c0_171 = arith.constant 0 : index
    %c0_172 = arith.constant 0 : index
    %347 = vector.load %arg3[%c3_170, %c0_171, %c0_172] : memref<9x8x128xf32, #tpu.memory_space<vmem>>, vector<1x8x128xf32>
    %348 = vector.shape_cast %347 : vector<1x8x128xf32> to vector<8x128xf32>
    %c1_173 = arith.constant 1 : index
    %c3_174 = arith.constant 3 : index
    %349 = memref.load %arg1[%c1_173, %c3_174] : memref<2x24xf32, #tpu.memory_space<smem>>
    %350 = vector.broadcast %349 : f32 to vector<8x128xf32>
    %351 = arith.mulf %350, %348 : vector<8x128xf32>
    %352 = arith.addf %342, %351 : vector<8x128xf32>
    %c1_175 = arith.constant 1 : index
    %c15_176 = arith.constant 15 : index
    %353 = memref.load %arg1[%c1_175, %c15_176] : memref<2x24xf32, #tpu.memory_space<smem>>
    %354 = vector.broadcast %353 : f32 to vector<8x128xf32>
    %355 = arith.mulf %354, %348 : vector<8x128xf32>
    %356 = arith.addf %346, %355 : vector<8x128xf32>
    %c4_177 = arith.constant 4 : index
    %c0_178 = arith.constant 0 : index
    %c0_179 = arith.constant 0 : index
    %357 = vector.load %arg3[%c4_177, %c0_178, %c0_179] : memref<9x8x128xf32, #tpu.memory_space<vmem>>, vector<1x8x128xf32>
    %358 = vector.shape_cast %357 : vector<1x8x128xf32> to vector<8x128xf32>
    %c1_180 = arith.constant 1 : index
    %c4_181 = arith.constant 4 : index
    %359 = memref.load %arg1[%c1_180, %c4_181] : memref<2x24xf32, #tpu.memory_space<smem>>
    %360 = vector.broadcast %359 : f32 to vector<8x128xf32>
    %361 = arith.mulf %360, %358 : vector<8x128xf32>
    %362 = arith.addf %352, %361 : vector<8x128xf32>
    %c1_182 = arith.constant 1 : index
    %c16_183 = arith.constant 16 : index
    %363 = memref.load %arg1[%c1_182, %c16_183] : memref<2x24xf32, #tpu.memory_space<smem>>
    %364 = vector.broadcast %363 : f32 to vector<8x128xf32>
    %365 = arith.mulf %364, %358 : vector<8x128xf32>
    %366 = arith.addf %356, %365 : vector<8x128xf32>
    %c5_184 = arith.constant 5 : index
    %c0_185 = arith.constant 0 : index
    %c0_186 = arith.constant 0 : index
    %367 = vector.load %arg3[%c5_184, %c0_185, %c0_186] : memref<9x8x128xf32, #tpu.memory_space<vmem>>, vector<1x8x128xf32>
    %368 = vector.shape_cast %367 : vector<1x8x128xf32> to vector<8x128xf32>
    %c1_187 = arith.constant 1 : index
    %c5_188 = arith.constant 5 : index
    %369 = memref.load %arg1[%c1_187, %c5_188] : memref<2x24xf32, #tpu.memory_space<smem>>
    %370 = vector.broadcast %369 : f32 to vector<8x128xf32>
    %371 = arith.mulf %370, %368 : vector<8x128xf32>
    %372 = arith.addf %362, %371 : vector<8x128xf32>
    %c1_189 = arith.constant 1 : index
    %c17_190 = arith.constant 17 : index
    %373 = memref.load %arg1[%c1_189, %c17_190] : memref<2x24xf32, #tpu.memory_space<smem>>
    %374 = vector.broadcast %373 : f32 to vector<8x128xf32>
    %375 = arith.mulf %374, %368 : vector<8x128xf32>
    %376 = arith.addf %366, %375 : vector<8x128xf32>
    %c6_191 = arith.constant 6 : index
    %c0_192 = arith.constant 0 : index
    %c0_193 = arith.constant 0 : index
    %377 = vector.load %arg3[%c6_191, %c0_192, %c0_193] : memref<9x8x128xf32, #tpu.memory_space<vmem>>, vector<1x8x128xf32>
    %378 = vector.shape_cast %377 : vector<1x8x128xf32> to vector<8x128xf32>
    %c1_194 = arith.constant 1 : index
    %c6_195 = arith.constant 6 : index
    %379 = memref.load %arg1[%c1_194, %c6_195] : memref<2x24xf32, #tpu.memory_space<smem>>
    %380 = vector.broadcast %379 : f32 to vector<8x128xf32>
    %381 = arith.mulf %380, %378 : vector<8x128xf32>
    %382 = arith.addf %372, %381 : vector<8x128xf32>
    %c1_196 = arith.constant 1 : index
    %c18_197 = arith.constant 18 : index
    %383 = memref.load %arg1[%c1_196, %c18_197] : memref<2x24xf32, #tpu.memory_space<smem>>
    %384 = vector.broadcast %383 : f32 to vector<8x128xf32>
    %385 = arith.mulf %384, %378 : vector<8x128xf32>
    %386 = arith.addf %376, %385 : vector<8x128xf32>
    %c7_198 = arith.constant 7 : index
    %c0_199 = arith.constant 0 : index
    %c0_200 = arith.constant 0 : index
    %387 = vector.load %arg3[%c7_198, %c0_199, %c0_200] : memref<9x8x128xf32, #tpu.memory_space<vmem>>, vector<1x8x128xf32>
    %388 = vector.shape_cast %387 : vector<1x8x128xf32> to vector<8x128xf32>
    %c1_201 = arith.constant 1 : index
    %c7_202 = arith.constant 7 : index
    %389 = memref.load %arg1[%c1_201, %c7_202] : memref<2x24xf32, #tpu.memory_space<smem>>
    %390 = vector.broadcast %389 : f32 to vector<8x128xf32>
    %391 = arith.mulf %390, %388 : vector<8x128xf32>
    %392 = arith.addf %382, %391 : vector<8x128xf32>
    %c1_203 = arith.constant 1 : index
    %c19_204 = arith.constant 19 : index
    %393 = memref.load %arg1[%c1_203, %c19_204] : memref<2x24xf32, #tpu.memory_space<smem>>
    %394 = vector.broadcast %393 : f32 to vector<8x128xf32>
    %395 = arith.mulf %394, %388 : vector<8x128xf32>
    %396 = arith.addf %386, %395 : vector<8x128xf32>
    %c8_205 = arith.constant 8 : index
    %c0_206 = arith.constant 0 : index
    %c0_207 = arith.constant 0 : index
    %397 = vector.load %arg3[%c8_205, %c0_206, %c0_207] : memref<9x8x128xf32, #tpu.memory_space<vmem>>, vector<1x8x128xf32>
    %398 = vector.shape_cast %397 : vector<1x8x128xf32> to vector<8x128xf32>
    %c1_208 = arith.constant 1 : index
    %c8_209 = arith.constant 8 : index
    %399 = memref.load %arg1[%c1_208, %c8_209] : memref<2x24xf32, #tpu.memory_space<smem>>
    %400 = vector.broadcast %399 : f32 to vector<8x128xf32>
    %401 = arith.mulf %400, %398 : vector<8x128xf32>
    %402 = arith.addf %392, %401 : vector<8x128xf32>
    %c1_210 = arith.constant 1 : index
    %c20_211 = arith.constant 20 : index
    %403 = memref.load %arg1[%c1_210, %c20_211] : memref<2x24xf32, #tpu.memory_space<smem>>
    %404 = vector.broadcast %403 : f32 to vector<8x128xf32>
    %405 = arith.mulf %404, %398 : vector<8x128xf32>
    %406 = arith.addf %396, %405 : vector<8x128xf32>
    %c1_212 = arith.constant 1 : index
    %c0_213 = arith.constant 0 : index
    %c0_214 = arith.constant 0 : index
    %c0_215 = arith.constant 0 : index
    %407 = vector.load %arg2[%c1_212, %c0_213, %c0_214, %c0_215] : memref<2x2x8x128xf32, #tpu.memory_space<vmem>>, vector<1x1x8x128xf32>
    %408 = vector.shape_cast %407 : vector<1x1x8x128xf32> to vector<8x128xf32>
    %409 = vector.shape_cast %402 : vector<8x128xf32> to vector<1x1x8x128xf32>
    tpu.vector_store %arg2[%c1_212, %c0_213, %c0_214, %c0_215], %409 {strides = array<i32>} : memref<2x2x8x128xf32, #tpu.memory_space<vmem>>, vector<1x1x8x128xf32>,
    %c1_216 = arith.constant 1 : index
    %c1_217 = arith.constant 1 : index
    %c0_218 = arith.constant 0 : index
    %c0_219 = arith.constant 0 : index
    %410 = vector.load %arg2[%c1_216, %c1_217, %c0_218, %c0_219] : memref<2x2x8x128xf32, #tpu.memory_space<vmem>>, vector<1x1x8x128xf32>
    %411 = vector.shape_cast %410 : vector<1x1x8x128xf32> to vector<8x128xf32>
    %412 = vector.shape_cast %406 : vector<8x128xf32> to vector<1x1x8x128xf32>
    tpu.vector_store %arg2[%c1_216, %c1_217, %c0_218, %c0_219], %412 {strides = array<i32>} : memref<2x2x8x128xf32, #tpu.memory_space<vmem>>, vector<1x1x8x128xf32>,
    return
  }
  func.func @transform_0(%arg0: i32) -> (i32, i32) {
    %c0_i32 = arith.constant 0 : i32
    %c0_i32_0 = arith.constant 0 : i32
    %c0_i32_1 = arith.constant 0 : i32
    return %c0_i32, %c0_i32_0 : i32, i32
  }
  func.func @transform_1(%arg0: i32) -> (i32, i32, i32, i32) {
    %c0_i32 = arith.constant 0 : i32
    %c0_i32_0 = arith.constant 0 : i32
    %c0_i32_1 = arith.constant 0 : i32
    %c0_i32_2 = arith.constant 0 : i32
    return %c0_i32, %c0_i32_0, %arg0, %c0_i32_1 : i32, i32, i32, i32
  }
}

</mosaic_0001>

<bundles_post_ra>
// kernel: tpu_custom_call.1
= control target key start
LH: loop header
LB: loop body
LE: loop exit
PB: predicated region body
PF: predicated region fallthrough
CT: control target
= control target key end

     0   :  { %s814_s0 = inlined_call_operand.hbm [shape: f32[2,24], index: 0, kind: input, shape index: {}]   ;;  %s815_s1 = inlined_call_operand.hbm [shape: f32[2,2,8,128], index: 1, kind: output, shape index: {}]  }
   0x1   :  { %821 = sst [smem:[#allocation13_spill]] %s815_s1 }
   0x2   :  { %6 = vsyncpa [#allocation5], 0 }
   0x3   :  { %7 = vsyncpa [#allocation4], 0  ;;  %s428_s8 = scalar_lea.hbm %s814_s0, 32 }
   0x4   :  { %p429_p0 = scmp.ne.s32.totalorder %s814_s0, %s428_s8  ;;  %p432_p1 = scmp.lt.u32.totalorder %s428_s8, %s814_s0 }
   0x6   :  { %p434_p2 = pnand %p432_p1, %p429_p0 }
   0x8   :  { %437 = shalt.err (!%p434_p2)
}
   0x9   :  { %s464_s13 = smov [#allocation3]  }
   0xa   :  { %15 = dma.hbm_to_smem %s814_s0, 32, %s464_s13, [#allocation5]  }
   0xb   :  { %460 = dma.done.wait [#allocation5], 32  }
   0xc   :  { %461 = vsyncadd [#allocation5], 4294967264 }
   0xd   :  { %19 = sfence }
   0xe   :  { %v20_v0 = vlaneseq  ;;  %s490_s16 = sld [smem:[#allocation3 + $0x9]]  ;;  %s492_s17 = sld [smem:[#allocation3 + $0xa]] }
   0xf   :  { %s494_s18 = sld [smem:[#allocation3 + $0xb]]  ;;  %s496_s19 = sld [smem:[#allocation3]] }
  0x10   :  { %v21_v1 = vshrl.u32 %v20_v0, 7  ;;  %v23_v2 = vand.u32 127, %v20_v0  ;;  %s498_s0 = sld [smem:[#allocation3 + $0x1]]  ;;  %s500_s20 = sld [smem:[#allocation3 + $0x2]] }
  0x11   :  { %s502_s21 = sld [smem:[#allocation3 + $0x3]]  ;;  %s506_s22 = sld [smem:[#allocation3 + $0x4]] }
  0x12   :  { %v25_v3 = vmul.u32 128, %v21_v1  ;;  %s508_s23 = sld [smem:[#allocation3 + $0x5]]  ;;  %s510_s24 = sld [smem:[#allocation3 + $0x6]] }
  0x13   :  { %s512_s25 = sld [smem:[#allocation3 + $0x7]]  ;;  %s514_s26 = sld [smem:[#allocation3 + $0x8]] }
  0x14   :  { %v28_v4 = vadd.s32 %v25_v3, %v23_v2  ;;  %s516_s27 = sld [smem:[#allocation3 + $0x15]]  ;;  %s518_s28 = sld [smem:[#allocation3 + $0x16]]  ;;  %v133_v16 = vstv %s492_s17  ;;  %v135_v17 = vstv %s490_s16 }
  0x15   :  { %s520_s29 = sld [smem:[#allocation3 + $0x17]]  ;;  %v138_v22 = vstv %s494_s18  ;;  %v153_v23 = vstv %s496_s19  ;;  %s544_s30 = sld [smem:[#allocation3 + $0xc]] }
  0x16   :  { %v29_v5 = vcvt.s32.f32 %v28_v4  ;;  %v162_v24 = vstv %s498_s0  ;;  %v171_v25 = vstv %s500_s20  ;;  %s547_s2 = sld [smem:[#allocation3 + $0xd]]  ;;  %s553_s3 = sld [smem:[#allocation3 + $0xe]] }
  0x17   :  { %v180_v30 = vstv %s502_s21  ;;  %v189_v31 = vstv %s506_s22  ;;  %s555_s4 = sld [smem:[#allocation3 + $0xf]]  ;;  %s557_s5 = sld [smem:[#allocation3 + $0x10]] }
  0x18   :  { %v30_v6 = vadd.f32 0.5, %v29_v5  ;;  %822 = sst [smem:[#allocation9_spill]] %s508_s23  ;;  %v198_v32 = vstv %s508_s23  ;;  %v207_v33 = vstv %s510_s24  ;;  %s559_s6 = sld [smem:[#allocation3 + $0x11]] }
  0x19   :  { %823 = sst [smem:[#allocation10_spill]] %s510_s24  ;;  %v216_v37 = vstv %s512_s25  ;;  %v225_v38 = vstv %s514_s26  ;;  %s561_s7 = sld [smem:[#allocation3 + $0x12]] }
  0x1a   :  { %v31_v7 = vmul.f32 0.0625, %v30_v6  ;;  %824 = sst [smem:[#allocation11_spill]] %s512_s25  ;;  %v143_v39 = vstv %s518_s28  ;;  %v145_v40 = vstv %s516_s27  ;;  %s563_s8 = sld [smem:[#allocation3 + $0x13]] }
  0x1b   :  { %825 = sst [smem:[#allocation12_spill]] %s514_s26  ;;  %v148_v41 = vstv %s520_s29  ;;  %s565_s9 = sld [smem:[#allocation3 + $0x14]]  ;;  %v157_v60 = vstv %s544_s30 }
  0x1c   :  { %v32_v8 = vfloor.f32 %v31_v7  ;;  %s567_s10 = sld [smem:[#allocation3 + $0x8a]]  ;;  %s569_s11 = sld [smem:[#allocation3 + $0x8b]]  ;;  %v166_v63 = vstv %s547_s2  ;;  %v175_v2 = vstv %s553_s3 }
  0x1d   :  { %s578_s12 = sld [smem:[#allocation3 + $0x96]]  ;;  %s583_s13 = sld [smem:[#allocation3 + $0x89]]  ;;  %v184_v4 = vstv %s555_s4 }
  0x1e   :  { %v33_v9 = vmul.f32 16.0, %v32_v8  ;;  %v37_v10 = vmul.f32 0.13333334, %v32_v8  ;;  %s590_s14 = sld [smem:[#allocation3 + $0x80]]  ;;  %s596_s15 = sld [smem:[#allocation3 + $0x81]]  ;;  %v202_v8 = vstv %s559_s6 }
  0x1f   :  { %s598_s1 = sld [smem:[#allocation3 + $0x97]]  ;;  %s605_s26 = sld [smem:[#allocation3 + $0x82]] }
  0x20   :  { %v34_v11 = vsub.f32 %v29_v5, %v33_v9  ;;  %v504_v12 = vadd.f32 -1.0, %v37_v10  ;;  %v193_v5 = vstv %s557_s5  ;;  %s607_s25 = sld [smem:[#allocation3 + $0x95]]  ;;  %s614_s24 = sld [smem:[#allocation3 + $0x83]]  ;;  %v211_v10 = vstv %s561_s7 }
  0x21   :  { %s616_s23 = sld [smem:[#allocation3 + $0x84]]  ;;  %s650_s17 = sld [smem:[#allocation3 + $0x85]] }
  0x22   :  { %v35_v13 = vmul.f32 0.13333334, %v34_v11  ;;  %v40_v15 = vmul.f32 %v504_v12, %v504_v12  ;;  %v44_v27 = vmul.f32 2.0, %v504_v12  ;;  %v53_v28 = vmul.f32 -0.0, %v504_v12  ;;  %s659_s16 = sld [smem:[#allocation3 + $0x8c]]  ;;  %s670_s18 = sld [smem:[#allocation3 + $0x8e]] }
  0x23   :  { %v63_v29 = vmul.f32 -2.0, %v504_v12  ;;  %v237_v11 = vstv %s567_s10  ;;  %s698_s19 = sld [smem:[#allocation3 + $0x90]]  ;;  %s731_s21 = sld [smem:[#allocation3 + $0x86]] }
  0x24   :  { %v522_v14 = vadd.f32 -1.0, %v35_v13  ;;  %s743_s27 = sld [smem:[#allocation3 + $0x91]]  ;;  %s749_s28 = sld [smem:[#allocation3 + $0x87]] }
  0x25   :  { %s758_s30 = sld [smem:[#allocation3 + $0x92]]  ;;  %s766_s2 = sld [smem:[#allocation3 + $0x88]] }
  0x26   :  { %v39_v18 = vmul.f32 %v522_v14, %v522_v14  ;;  %v42_v19 = vmul.f32 2.0, %v522_v14  ;;  %v73_v20 = vmul.f32 -0.0, %v522_v14  ;;  %v102_v21 = vmul.f32 -2.0, %v522_v14 }
  0x27   :  { %v134_v9 = vmul.f32 %v522_v14, %v133_v16  ;;  %v144_v13 = vmul.f32 %v522_v14, %v143_v39  ;;  %v247_v16 = vstv %s578_s12 }
  0x28   :  { %v41_v26 = vadd.f32 %v40_v15, %v39_v18  ;;  %v220_v15 = vstv %s563_s8 }
  0x2a   :  { %v43_v34 = vadd.f32 %v42_v19, %v41_v26  ;;  %v74_v35 = vadd.f32 %v73_v20, %v41_v26  ;;  %v103_v36 = vadd.f32 %v102_v21, %v41_v26  ;;  %v242_v19 = vstv %s569_s11 }
  0x2b   :  { %v229_v20 = vstv %s565_s9  ;;  %v238_v21 = vmul.f32 %v522_v14, %v237_v11  ;;  %v239_v26 = vstv %s583_s13  ;;  %v243_v39 = vmul.f32 %v504_v12, %v242_v19 }
  0x2c   :  { %v45_v42 = vadd.f32 %v44_v27, %v43_v34  ;;  %v54_v43 = vadd.f32 %v53_v28, %v43_v34  ;;  %v64_v44 = vadd.f32 %v63_v29, %v43_v34  ;;  %v75_v45 = vadd.f32 %v74_v35, %v44_v27 }
  0x2d   :  { %v84_v46 = vadd.f32 %v74_v35, %v53_v28  ;;  %v93_v47 = vadd.f32 %v74_v35, %v63_v29  ;;  %v104_v48 = vadd.f32 %v103_v36, %v44_v27  ;;  %v113_v49 = vadd.f32 %v103_v36, %v53_v28 }
  0x2e   :  { %v46_v50 = vadd.f32 2.0, %v45_v42  ;;  %v55_v51 = vadd.f32 1.0, %v54_v43  ;;  %v65_v52 = vadd.f32 2.0, %v64_v44  ;;  %v76_v53 = vadd.f32 1.0, %v75_v45 }
  0x2f   :  { %vm86_vm0 = vcmp.le.f32.partialorder %v84_v46, 0.0  ;;  %v94_v54 = vadd.f32 1.0, %v93_v47  ;;  %v105_v55 = vadd.f32 2.0, %v104_v48  ;;  %v114_v56 = vadd.f32 1.0, %v113_v49 }
  0x30   :  { %vm47_vm1 = vcmp.le.f32.partialorder %v46_v50, 0.0  ;;  %vm56_vm2 = vcmp.le.f32.partialorder %v55_v51, 0.0  ;;  %vm66_vm3 = vcmp.le.f32.partialorder %v65_v52, 0.0  ;;  %vm77_vm4 = vcmp.le.f32.partialorder %v76_v53, 0.0 }
  0x31   :  { %v571_v57 = vsel %vm47_vm1, 1.0, %v46_v50  ;;  %v573_v58 = vsel %vm56_vm2, 1.0, %v55_v51  ;;  %v575_v59 = vsel %vm66_vm3, 1.0, %v65_v52  ;;  %v581_v61 = vsel %vm77_vm4, 1.0, %v76_v53 }
  0x32   :  { %410 = vlog2.f32 %v571_v57  ;;  %vm95_vm5 = vcmp.le.f32.partialorder %v94_v54, 0.0  ;;  %vm106_vm6 = vcmp.le.f32.partialorder %v105_v55, 0.0  ;;  %v587_v62 = vsel %vm86_vm0, 1.0, %v84_v46 }
  0x33   :  { %412 = vlog2.f32 %v573_v58  ;;  %vm115_vm7 = vcmp.le.f32.partialorder %v114_v56, 0.0  ;;  %v593_v0 = vsel %vm95_vm5, 1.0, %v94_v54  ;;  %v122_v1 = vadd.f32 %v103_v36, %v63_v29 }
  0x34   :  { %414 = vlog2.f32 %v575_v59  ;;  %v601_v3 = vsel %vm106_vm6, 1.0, %v105_v55  ;;  %v611_v6 = vsel %vm115_vm7, 1.0, %v114_v56  ;;  %v136_v27 = vadd.f32 %v135_v17, %v134_v9 }
  0x35   :  { %416 = vlog2.f32 %v581_v61  ;;  %v123_v7 = vadd.f32 2.0, %v122_v1  ;;  %v139_v28 = vmul.f32 %v504_v12, %v138_v22  ;;  %v149_v29 = vmul.f32 %v504_v12, %v148_v41 }
  0x36   :  { %418 = vlog2.f32 %v587_v62  ;;  %v257_v34 = vstv %s590_s14  ;;  %v146_v36 = vadd.f32 %v145_v40, %v144_v13  ;;  %v248_v42 = vmul.f32 %v522_v14, %v247_v16 }
  0x37   :  { %420 = vlog2.f32 %v593_v0  ;;  %vm124_vm8 = vcmp.le.f32.partialorder %v123_v7, 0.0  ;;  %v252_v43 = vstv %s598_s1  ;;  %v266_v45 = vstv %s596_s15  ;;  %s668_s1 = sld [smem:[#allocation3 + $0x8d]] }
  0x38   :  { %422 = vlog2.f32 %v601_v3  ;;  %v630_v18 = vsel %vm124_vm8, 1.0, %v123_v7  ;;  %v275_v22 = vstv %s605_s26  ;;  %v249_v46 = vstv %s607_s25  ;;  %s681_s25 = sld [smem:[#allocation3 + $0x8f]]  ;;  %s773_s26 = sld [smem:[#allocation3 + $0x93]] }
  0x39   :  { %424 = vlog2.f32 %v611_v6  ;;  %v240_v48 = vadd.f32 %v239_v26, %v238_v21  ;;  %v284_v49 = vstv %s614_s24  ;;  %v293_v50 = vstv %s616_s23  ;;  %s783_s24 = sld [smem:[#allocation3 + $0x94]]  ;;  %s465_s23 = smov [#allocation6]  }
  0x3a   :  { %426 = vlog2.f32 %v630_v18  ;;  %v140_v52 = vadd.f32 %v139_v28, %v136_v27  ;;  %v253_v53 = vmul.f32 %v504_v12, %v252_v43  ;;  %v150_v1 = vadd.f32 %v149_v29, %v146_v36  ;;  %s345_s3 = sshll.u32 %s465_s23, 4  ;;  %s346_s3 = int_to_ptr.vmem [resolvable:$true] %s345_s3 }
  0x3b   :  { %v250_v7 = vadd.f32 %v249_v46, %v248_v42  ;;  %v244_v29 = vadd.f32 %v243_v39, %v240_v48  ;;  %s438_s4 = scalar_lea.vmem %s346_s3, 512  ;;  %p443_p4 = scmp.lt.s32.totalorder %s346_s3, %s346_s3 }
  0x3c   :  { %v411_v35 = vpop.eup %410  ;;  %p439_p3 = scmp.ne.s32.totalorder %s346_s3, %s438_s4  ;;  %p444_p5 = scmp.lt.s32.totalorder %s438_s4, %s438_s4 }
  0x3d   :  { %v413_v17 = vpop.eup %412  ;;  %v50_v44 = vmul.f32 0.6931472, %v411_v35  ;;  %v254_v35 = vadd.f32 %v253_v53, %v250_v7  ;;  %v270_v48 = vstv %s668_s1 }
  0x3e   :  { %v415_v47 = vpop.eup %414  ;;  %v59_v41 = vmul.f32 0.6931472, %v413_v17  ;;  %p445_p6 = por %p444_p5, %p443_p4 }
  0x3f   :  { %v417_v40 = vpop.eup %416  ;;  %v662_v51 = vmul.f32 %v50_v44, %v571_v57  ;;  %v69_v14 = vmul.f32 0.6931472, %v415_v47  ;;  %v261_v44 = vstv %s659_s16 }
  0x40   :  { %v419_v54 = vpop.eup %418  ;;  %v666_v55 = vmul.f32 %v59_v41, %v573_v58  ;;  %v80_v56 = vmul.f32 0.6931472, %v417_v40  ;;  %p446_p7 = pnand %p445_p6, %p439_p3 }
  0x41   :  { %v421_v57 = vpop.eup %420  ;;  %v673_v9 = vmul.f32 %v69_v14, %v575_v59  ;;  %v89_v11 = vmul.f32 0.6931472, %v419_v54  ;;  %v154_v12 = vmul.f32 %v153_v23, %v662_v51  ;;  %v158_v58 = vmul.f32 %v157_v60, %v662_v51 }
  0x42   :  { %v423_v13 = vpop.eup %422  ;;  %v684_v19 = vmul.f32 %v80_v56, %v581_v61  ;;  %v98_v16 = vmul.f32 0.6931472, %v421_v57  ;;  %v163_v21 = vmul.f32 %v162_v24, %v666_v55  ;;  %v167_v59 = vmul.f32 %v166_v63, %v666_v55 }
  0x43   :  { %v425_v26 = vpop.eup %424  ;;  %v693_v23 = vmul.f32 %v89_v11, %v587_v62  ;;  %v109_v60 = vmul.f32 0.6931472, %v423_v13  ;;  %v155_v27 = vadd.f32 %v154_v12, %v140_v52  ;;  %v172_v61 = vmul.f32 %v171_v25, %v673_v9 }
  0x44   :  { %v427_v28 = vpop.eup %426  ;;  %v159_v24 = vadd.f32 %v158_v58, %v150_v1  ;;  %v302_v63 = vstv %s650_s17  ;;  %v702_v62 = vmul.f32 %v98_v16, %v593_v0  ;;  %v118_v36 = vmul.f32 0.6931472, %v425_v26 }
  0x45   :  { %v164_v42 = vadd.f32 %v163_v21, %v155_v27  ;;  %v181_v25 = vmul.f32 %v180_v30, %v684_v19  ;;  %v708_v43 = vmul.f32 %v109_v60, %v601_v3  ;;  %v176_v39 = vmul.f32 %v175_v2, %v673_v9 }
  0x46   :  { %v168_v17 = vadd.f32 %v167_v59, %v159_v24  ;;  %v127_v46 = vmul.f32 0.6931472, %v427_v28  ;;  %v190_v47 = vmul.f32 %v189_v31, %v693_v23  ;;  %v185_v30 = vmul.f32 %v184_v4, %v684_v19 }
  0x47   :  { %v173_v0 = vadd.f32 %v172_v61, %v164_v42  ;;  %v194_v3 = vmul.f32 %v193_v5, %v693_v23  ;;  %v279_v2 = vstv %s670_s18  ;;  %v726_v40 = vmul.f32 %v118_v36, %v611_v6 }
  0x48   :  { %v177_v41 = vadd.f32 %v176_v39, %v168_v17  ;;  %v199_v52 = vmul.f32 %v198_v32, %v702_v62  ;;  %v288_v31 = vstv %s681_s25  ;;  %v203_v5 = vmul.f32 %v202_v8, %v702_v62 }
  0x49   :  { %v182_v14 = vadd.f32 %v181_v25, %v173_v0  ;;  %v258_v53 = vmul.f32 %v257_v34, %v662_v51  ;;  %v267_v6 = vmul.f32 %v266_v45, %v666_v55  ;;  %v128_v32 = vmul.f32 %v127_v46, %v630_v18 }
  0x4a   :  { %v186_v4 = vadd.f32 %v185_v30, %v177_v41  ;;  %v208_v56 = vmul.f32 %v207_v33, %v708_v43  ;;  %v297_v1 = vstv %s698_s19  ;;  %v212_v34 = vmul.f32 %v211_v10, %v708_v43 }
  0x4b   :  { %v191_v54 = vadd.f32 %v190_v47, %v182_v14  ;;  %v259_v7 = vadd.f32 %v258_v53, %v244_v29  ;;  %v276_v45 = vmul.f32 %v275_v22, %v673_v9  ;;  %v217_v57 = vmul.f32 %v216_v37, %v726_v40 }
  0x4c   :  { %v195_v8 = vadd.f32 %v194_v3, %v186_v4  ;;  %v221_v33 = vmul.f32 %v220_v15, %v726_v40  ;;  %v262_v11 = vmul.f32 %v261_v44, %v662_v51  ;;  %v285_v22 = vmul.f32 %v284_v49, %v684_v19 }
  0x4d   :  { %v200_v18 = vadd.f32 %v199_v52, %v191_v54  ;;  %v268_v12 = vadd.f32 %v267_v6, %v259_v7  ;;  %v271_v58 = vmul.f32 %v270_v48, %v666_v55  ;;  %v226_v13 = vmul.f32 %v225_v38, %v128_v32 }
  0x4e   :  { %v204_v10 = vadd.f32 %v203_v5, %v195_v8  ;;  %v263_v15 = vadd.f32 %v262_v11, %v254_v35  ;;  %v280_v16 = vmul.f32 %v279_v2, %v673_v9  ;;  %v230_v21 = vmul.f32 %v229_v20, %v128_v32 }
  0x4f   :  { %v209_v37 = vadd.f32 %v208_v56, %v200_v18  ;;  %v277_v59 = vadd.f32 %v276_v45, %v268_v12  ;;  %v294_v49 = vmul.f32 %v293_v50, %v693_v23  ;;  %v311_v26 = vstv %s731_s21 }
  0x50   :  { %v213_v51 = vadd.f32 %v212_v34, %v204_v10  ;;  %v272_v60 = vadd.f32 %v271_v58, %v263_v15  ;;  %v289_v38 = vmul.f32 %v288_v31, %v684_v19  ;;  %v303_v9 = vmul.f32 %v302_v63, %v702_v62 }
  0x51   :  { %v218_v55 = vadd.f32 %v217_v57, %v209_v37  ;;  %v286_v61 = vadd.f32 %v285_v22, %v277_v59  ;;  %v306_v28 = vstv %s743_s27  ;;  %v320_v24 = vstv %s749_s28 }
  0x52   :  { %v222_v27 = vadd.f32 %v221_v33, %v213_v51  ;;  %v281_v29 = vadd.f32 %v280_v16, %v272_v60  ;;  %v298_v50 = vmul.f32 %v297_v1, %v693_v23  ;;  %v312_v42 = vmul.f32 %v311_v26, %v708_v43 }
  0x53   :  { %v227_v20 = vadd.f32 %v226_v13, %v218_v55  ;;  %v295_v36 = vadd.f32 %v294_v49, %v286_v61  ;;  %v315_v25 = vstv %s758_s30  ;;  %v329_v19 = vstv %s766_s2 }
  0x54   :  { %v231_v35 = vadd.f32 %v230_v21, %v222_v27  ;;  %v290_v17 = vadd.f32 %v289_v38, %v281_v29  ;;  %v307_v39 = vmul.f32 %v306_v28, %v702_v62  ;;  %v321_v44 = vmul.f32 %v320_v24, %v726_v40 }
  0x55   :  { %232 = vst [vmem:[#allocation6] sm:$0xff] %v227_v20  ;;  %v304_v63 = vadd.f32 %v303_v9, %v295_v36  ;;  %v324_v46 = vstv %s773_s26  ;;  %v316_v47 = vmul.f32 %v315_v25, %v708_v43  ;;  %v330_v30 = vmul.f32 %v329_v19, %v128_v32 }
  0x56   :  { %234 = vst [vmem:[#allocation6 + $0x8] sm:$0xff] %v231_v35  ;;  %v299_v0 = vadd.f32 %v298_v50, %v290_v17  ;;  %v333_v41 = vstv %s783_s24  ;;  %v325_v48 = vmul.f32 %v324_v46, %v726_v40 }
  0x57   :  { %v313_v23 = vadd.f32 %v312_v42, %v304_v63  ;;  %v334_v52 = vmul.f32 %v333_v41, %v128_v32 }
  0x58   :  { %v308_v3 = vadd.f32 %v307_v39, %v299_v0 }
  0x59   :  { %v322_v2 = vadd.f32 %v321_v44, %v313_v23 }
  0x5a   :  { %v317_v14 = vadd.f32 %v316_v47, %v308_v3 }
  0x5b   :  { %v331_v62 = vadd.f32 %v330_v30, %v322_v2 }
  0x5c   :  { %v326_v31 = vadd.f32 %v325_v48, %v317_v14 }
  0x5d   :  { %337 = vst [vmem:[#allocation6 + $0x10] sm:$0xff] %v331_v62 }
  0x5e   :  { %v335_v4 = vadd.f32 %v334_v52, %v326_v31 }
  0x60   :  { %339 = vst [vmem:[#allocation6 + $0x18] sm:$0xff] %v335_v4 }
  0x61   :  { %449 = shalt.err (!%p446_p7)
}
  0x62   :  { %s830_s7 = sld [smem:[#allocation13_spill]] }
  0x68   :  { %s450_s8 = scalar_lea.hbm %s830_s7, 512 }
  0x69   :  { %p451_p8 = scmp.ne.s32.totalorder %s830_s7, %s450_s8  ;;  %p454_p9 = scmp.lt.u32.totalorder %s450_s8, %s830_s7 }
  0x6b   :  { %p456_p10 = pnand %p454_p9, %p451_p8 }
  0x6d   :  { %459 = shalt.err (!%p456_p10)
}
  0x6e   :  { %s466_s13 = smov 128   ;;  %s467_s14 = smov 8  }
  0x6f   :  { %351 = dma.vmem_to_hbm [thread:$0]  %s346_s3, 512, %s830_s7, [#allocation4], %s466_s13, %s466_s13, %s467_s14  }
  0x70   :  { %462 = dma.done.wait [#allocation4], 512  }
  0x71   :  { %463 = vsyncadd [#allocation4], 4294966784 }
  0x72   :  { %355 = vsyncpa [#allocation4], 1 }
  0x73   :  { %356 = vsyncpa [#allocation5], 1 }

</bundles_post_ra>
